<compile_context>
chip_gen: v6e
topology: v6e:2x2x1
jax: 0.10.0
libtpu: 0.0.40
codegen_flags: <defaults>
</compile_context>

<pallas_src>
import jax
import jax.numpy as jnp
from jax.experimental import pallas as pl
from jax.experimental.pallas import tpu as pltpu

_LANE = 128
_TARGET_TILE_BYTES = 4 * 1024 * 1024  # per x tile (native dtype); in+out double-buffered ~16 MiB


def _fbn_kernel(x_ref, scale_ref, shift_ref, o_ref):
    # Pure bandwidth-bound fused multiply-add: y = x * scale + shift.
    # scale/shift are f32 and broadcast against x (promotion happens in-register),
    # result is cast back to the output's native dtype.
    o_ref[...] = (x_ref[...] * scale_ref[...] + shift_ref[...]).astype(o_ref.dtype)


def _vmem_limit(tile_bytes, param_bytes):
    # in + out double-buffered tiles + double-buffered param blocks + margin,
    # floored at 32 MiB and capped below v7x's 64 MiB physical VMEM.
    need = 4 * tile_bytes + 4 * param_bytes + (2 << 20)
    return int(min(48 << 20, max(32 << 20, need)))


def frozen_batch_norm_2d(x, weight, bias, running_mean, running_var, eps=1e-5):
    """x: (N, C, H, W); frozen buffers: (C,). Matches FrozenBatchNorm2d.forward."""
    N, C, H, W = x.shape
    HW = H * W
    itemsize = jnp.dtype(x.dtype).itemsize
    target_elems = max(1, _TARGET_TILE_BYTES // itemsize)

    # Fold frozen stats into per-channel scale/shift, always in f32 (matches the
    # fp32 frozen buffers in PyTorch even if they are handed to us in bf16).
    w32 = weight.astype(jnp.float32)
    b32 = bias.astype(jnp.float32)
    rm32 = running_mean.astype(jnp.float32)
    rv32 = running_var.astype(jnp.float32)
    scale = w32 * jax.lax.rsqrt(rv32 + jnp.float32(eps))  # (C,)
    shift = b32 - rm32 * scale                            # (C,)

    # Lane-dense flat path for small ragged feature maps (7x7, 14x14, ...):
    # view x as (N, C*HW) so stores are unmasked; per-channel params are
    # expanded to length C*HW (tiny at these sizes).
    use_flat = (HW % _LANE != 0) and (HW <= 1024) and (C * HW * 4 <= 8 * 1024 * 1024)

    if use_flat:
        L = C * HW
        x2 = x.reshape(N, L)                              # free, contiguous view
        scale_flat = jnp.repeat(scale, HW).reshape(1, L)  # channel-major matches reshape
        shift_flat = jnp.repeat(shift, HW).reshape(1, L)

        if L % _LANE == 0:
            lt = max(_LANE, (target_elems // max(N, 1)) // _LANE * _LANE)
            Lt = L if L <= lt else lt
        else:
            Lt = L  # full extent (always legal)
        n_l = pl.cdiv(L, Lt)

        tile_bytes = N * Lt * itemsize
        param_bytes = 2 * Lt * 4

        y2 = pl.pallas_call(
            _fbn_kernel,
            out_shape=jax.ShapeDtypeStruct((N, L), x.dtype),
            grid_spec=pltpu.PrefetchScalarGridSpec(
                num_scalar_prefetch=0,
                grid=(n_l,),
                in_specs=[
                    pl.BlockSpec((N, Lt), lambda li: (0, li)),
                    pl.BlockSpec((1, Lt), lambda li: (0, li)),
                    pl.BlockSpec((1, Lt), lambda li: (0, li)),
                ],
                out_specs=pl.BlockSpec((N, Lt), lambda li: (0, li)),
            ),
            compiler_params=pltpu.CompilerParams(
                dimension_semantics=("parallel",),
                vmem_limit_bytes=_vmem_limit(tile_bytes, param_bytes),
            ),
        )(x2, scale_flat, shift_flat)
        return y2.reshape(N, C, H, W)

    # Default path: free view (N, C, HW); channels -> sublanes, HW -> lanes.
    x3 = x.reshape(N, C, HW)
    scale2 = scale.reshape(C, 1)
    shift2 = shift.reshape(C, 1)

    # Channel tile: full C if small (always legal), else 256 (multiple of 8).
    Ct = C if C <= 256 else 256
    # Lane tile: multiple of 128 sized so Ct*Lt ~ target, or full HW if smaller.
    lt = max(_LANE, (target_elems // Ct) // _LANE * _LANE)
    Lt = HW if HW <= lt else lt
    # If one (C, HW) slab is still small, fold several batch elements per step.
    Nb = 1
    if Ct == C and Lt == HW:
        Nb = min(N, max(1, target_elems // max(C * HW, 1)))

    n_n = pl.cdiv(N, Nb)
    n_c = pl.cdiv(C, Ct)
    n_l = pl.cdiv(HW, Lt)

    tile_bytes = Nb * Ct * Lt * itemsize
    param_bytes = 2 * Ct * 4

    y3 = pl.pallas_call(
        _fbn_kernel,
        out_shape=jax.ShapeDtypeStruct((N, C, HW), x.dtype),
        grid_spec=pltpu.PrefetchScalarGridSpec(
            num_scalar_prefetch=0,
            # HW-tile axis leading (usually the axis with the most blocks ->
            # good 2-TC split on v7x); batch tiles innermost so the (Ct, 1)
            # param blocks stay resident across consecutive steps.
            grid=(n_l, n_c, n_n),
            in_specs=[
                pl.BlockSpec((Nb, Ct, Lt), lambda li, ci, ni: (ni, ci, li)),
                pl.BlockSpec((Ct, 1), lambda li, ci, ni: (ci, 0)),
                pl.BlockSpec((Ct, 1), lambda li, ci, ni: (ci, 0)),
            ],
            out_specs=pl.BlockSpec((Nb, Ct, Lt), lambda li, ci, ni: (ni, ci, li)),
        ),
        compiler_params=pltpu.CompilerParams(
            dimension_semantics=("parallel", "parallel", "parallel"),
            vmem_limit_bytes=_vmem_limit(tile_bytes, param_bytes),
        ),
    )(x3, scale2, shift2)
    return y3.reshape(N, C, H, W)


def _reference(x, weight, bias, running_mean, running_var, eps):
    # Mirrors the PyTorch forward exactly.
    C = x.shape[1]
    w = weight.reshape(1, C, 1, 1)
    b = bias.reshape(1, C, 1, 1)
    rv = running_var.reshape(1, C, 1, 1)
    rm = running_mean.reshape(1, C, 1, 1)
    scale = w * jax.lax.rsqrt(rv + eps)
    return x * scale + (b - rm * scale)


if __name__ == "__main__":
    key = jax.random.PRNGKey(0)
    eps = 1e-5

    def run_case(shape, subkey):
        N, C, H, W = shape
        kx, kv, km = jax.random.split(subkey, 3)
        x = jax.random.normal(kx, (N, C, H, W), dtype=jnp.float32)
        # Frozen-buffer defaults are ones/zeros; perturb deterministically so
        # the check is non-trivial.
        weight = jnp.ones((C,), jnp.float32) + 0.1 * jnp.arange(C, dtype=jnp.float32)
        bias = jnp.zeros((C,), jnp.float32) + 0.05 * jnp.arange(C, dtype=jnp.float32)
        running_mean = 0.2 * jax.random.normal(km, (C,), dtype=jnp.float32)
        running_var = jnp.ones((C,), jnp.float32) + 0.3 * jax.random.uniform(kv, (C,))

        y = frozen_batch_norm_2d(x, weight, bias, running_mean, running_var, eps=eps)
        y = jax.block_until_ready(y)
        y_ref = _reference(x, weight, bias, running_mean, running_var, eps)
        assert y.shape == (N, C, H, W)
        assert jnp.allclose(y, y_ref, atol=1e-6, rtol=1e-6)

    k1, k2 = jax.random.split(key)
    # Lane-aligned path (N, C, HW) with HW a multiple of 128.
    run_case((2, 4, 16, 16), k1)
    # Ragged small feature map (HW = 49) -> lane-dense flat path.
    run_case((2, 8, 7, 7), k2)

    print("KERNEL_OK")
</pallas_src>

<mosaic_0001>
module attributes {stable_mosaic.version = 11 : i64} {
  func.func @_fbn_kernel(%arg0: i32, %arg1: i32, %arg2: i32, %arg3: memref<2x4x256xf32, #tpu.memory_space<vmem>>, %arg4: memref<4x1xf32, #tpu.memory_space<vmem>>, %arg5: memref<4x1xf32, #tpu.memory_space<vmem>>, %arg6: memref<2x4x256xf32, #tpu.memory_space<vmem>>) attributes {dimension_semantics = [#tpu.dimension_semantics<parallel>, #tpu.dimension_semantics<parallel>, #tpu.dimension_semantics<parallel>], iteration_bounds = array<i64: 1, 1, 1>, scalar_prefetch = 0 : i64, scratch_operands = 0 : i64, tpu.core_type = #tpu.core_type<tc>, window_params = [{transform_indices = @transform_0, window_bounds = array<i64: 2, 4, 256>}, {transform_indices = @transform_1, window_bounds = array<i64: 4, 1>}, {transform_indices = @transform_2, window_bounds = array<i64: 4, 1>}, {transform_indices = @transform_3, window_bounds = array<i64: 2, 4, 256>}]} {
    %c0 = arith.constant 0 : index
    %c0_0 = arith.constant 0 : index
    %c0_1 = arith.constant 0 : index
    %0 = vector.load %arg3[%c0, %c0_0, %c0_1] : memref<2x4x256xf32, #tpu.memory_space<vmem>>, vector<2x4x256xf32>
    %c0_2 = arith.constant 0 : index
    %c0_3 = arith.constant 0 : index
    %1 = vector.load %arg4[%c0_2, %c0_3] : memref<4x1xf32, #tpu.memory_space<vmem>>, vector<4x1xf32>
    %2 = vector.shape_cast %1 : vector<4x1xf32> to vector<1x4x1xf32>
    %3 = vector.broadcast %2 : vector<1x4x1xf32> to vector<2x4x256xf32>
    %4 = arith.mulf %0, %3 : vector<2x4x256xf32>
    %c0_4 = arith.constant 0 : index
    %c0_5 = arith.constant 0 : index
    %5 = vector.load %arg5[%c0_4, %c0_5] : memref<4x1xf32, #tpu.memory_space<vmem>>, vector<4x1xf32>
    %6 = vector.shape_cast %5 : vector<4x1xf32> to vector<1x4x1xf32>
    %7 = vector.broadcast %6 : vector<1x4x1xf32> to vector<2x4x256xf32>
    %8 = arith.addf %4, %7 : vector<2x4x256xf32>
    %c0_6 = arith.constant 0 : index
    %c0_7 = arith.constant 0 : index
    %c0_8 = arith.constant 0 : index
    %9 = vector.load %arg6[%c0_6, %c0_7, %c0_8] : memref<2x4x256xf32, #tpu.memory_space<vmem>>, vector<2x4x256xf32>
    tpu.vector_store %arg6[%c0_6, %c0_7, %c0_8], %8 {strides = array<i32>} : memref<2x4x256xf32, #tpu.memory_space<vmem>>, vector<2x4x256xf32>,
    return
  }
  func.func @transform_0(%arg0: i32, %arg1: i32, %arg2: i32) -> (i32, i32, i32) {
    %c0_i32 = arith.constant 0 : i32
    return %arg2, %arg1, %arg0 : i32, i32, i32
  }
  func.func @transform_1(%arg0: i32, %arg1: i32, %arg2: i32) -> (i32, i32) {
    %c0_i32 = arith.constant 0 : i32
    %c0_i32_0 = arith.constant 0 : i32
    return %arg1, %c0_i32 : i32, i32
  }
  func.func @transform_2(%arg0: i32, %arg1: i32, %arg2: i32) -> (i32, i32) {
    %c0_i32 = arith.constant 0 : i32
    %c0_i32_0 = arith.constant 0 : i32
    return %arg1, %c0_i32 : i32, i32
  }
  func.func @transform_3(%arg0: i32, %arg1: i32, %arg2: i32) -> (i32, i32, i32) {
    %c0_i32 = arith.constant 0 : i32
    return %arg2, %arg1, %arg0 : i32, i32, i32
  }
}

</mosaic_0001>

<bundles_post_ra>
// kernel: tpu_custom_call.1
= control target key start
LH: loop header
LB: loop body
LE: loop exit
PB: predicated region body
PF: predicated region fallthrough
CT: control target
= control target key end

     0   :  { %8 = vsyncpa [#allocation3], 0  ;;  %s175_s0 = inlined_call_operand.hbm [shape: f32[2,4,256], index: 0, kind: input, shape index: {}]   ;;  %s176_s1 = inlined_call_operand.vmem [shape: f32[4,1], index: 1, kind: input, shape index: {}]   ;;  %s177_s2 = inlined_call_operand.vmem [shape: f32[4,1], index: 2, kind: input, shape index: {}]   ;;  %s178_s3 = inlined_call_operand.hbm [shape: f32[2,4,256], index: 3, kind: output, shape index: {}]  }
   0x1   :  { %9 = vsyncpa [#allocation4], 0  ;;  %s131_s12 = smov [#allocation2]  }
   0x2   :  { %s15_s13 = sshll.u32 %s131_s12, 4  ;;  %s16_s13 = int_to_ptr.vmem [resolvable:$true] %s15_s13 }
   0x3   :  { %s95_s14 = scalar_lea.vmem %s16_s13, 256  ;;  %p100_p1 = scmp.lt.s32.totalorder %s16_s13, %s16_s13 }
   0x4   :  { %p96_p0 = scmp.ne.s32.totalorder %s16_s13, %s95_s14  ;;  %p101_p2 = scmp.lt.s32.totalorder %s95_s14, %s95_s14 }
   0x6   :  { %p102_p3 = por %p101_p2, %p100_p1 }
   0x8   :  { %p103_p4 = pnand %p102_p3, %p96_p0 }
   0xa   :  { %106 = shalt.err (!%p103_p4)
}
   0xb   :  { %s132_s15 = smov 128   ;;  %s133_s16 = smov 8  }
   0xc   :  { %21 = dma.hbm_to_vmem [thread:$0]  %s175_s0, 256, %s16_s13, [#allocation3], %s132_s15, %s132_s15, %s133_s16  }
   0xd   :  { %127 = dma.done.wait [#allocation3], 256  }
   0xe   :  { %128 = vsyncadd [#allocation3], 4294967040  ;;  %v134_v0 = vmov 0   ;;  %v31_v1 = vld [vmem:[%s176_s1] sm:$0xf]  ;;  %v39_v5 = vlaneseq  ;;  %v30_v12 = vld [vmem:[#allocation2 + $0x8] sm:$0xff] }
   0xf   :  { %86 = vset.pattern.permute.xlu0 %v134_v0  ;;  %v46_v2 = vld [vmem:[%s177_s2] sm:$0xf]  ;;  %v135_v3 = vmov 839922192   ;;  %s136_s0 = smov [#allocation5]  }
  0x10   :  { %34 = vperm.xlu0 %86, %v31_v1   ;;  %v37_v4 = vunpack.c.l.s4 %v135_v3  ;;  %v40_v7 = vshrl.u32 %v39_v5, 7  ;;  %v29_v11 = vld [vmem:[#allocation2] sm:$0xff]  ;;  %s68_s23 = sshll.u32 %s136_s0, 4  ;;  %s69_s23 = int_to_ptr.vmem [resolvable:$true] %s68_s23 }
  0x11   :  { %s107_s1 = scalar_lea.vmem %s69_s23, 256  ;;  %p112_p6 = scmp.lt.s32.totalorder %s69_s23, %s69_s23 }
  0x12   :  { %v38_v6 = vunpack.c.0.s8 %v37_v4  ;;  %p108_p5 = scmp.ne.s32.totalorder %s69_s23, %s107_s1  ;;  %p113_p7 = scmp.lt.s32.totalorder %s107_s1, %s107_s1 }
  0x14   :  { %49 = vperm.xlu0 %86, %v46_v2   ;;  %v41_v8 = vsub.s32 %v38_v6, %v40_v7  ;;  %p114_p8 = por %p113_p7, %p112_p6 }
  0x16   :  { %p115_p9 = pnand %p114_p8, %p108_p5 }
  0x8b   :  { %v35_v9 = vpop.permute.xlu0 %34 }
  0x8c   :  { %v42_v10 = vrot.slane %v35_v9, %v41_v8 }
  0x8e   :  { %v44_v14 = vmul.f32 %v42_v10, %v29_v11  ;;  %v45_v15 = vmul.f32 %v42_v10, %v30_v12 }
  0x8f   :  { %v50_v13 = vpop.permute.xlu0 %49 }
  0x90   :  { %v57_v16 = vrot.slane %v50_v13, %v41_v8 }
  0x92   :  { %v59_v17 = vadd.f32 %v57_v16, %v44_v14  ;;  %v60_v18 = vadd.f32 %v57_v16, %v45_v15 }
  0x94   :  { %61 = vst [vmem:[#allocation5] sm:$0xff] %v59_v17  ;;  %62 = vst [vmem:[#allocation5 + $0x8] sm:$0xff] %v60_v18 }
  0x95   :  { %118 = shalt.err (!%p115_p9)
}
  0x96   :  { %74 = dma.vmem_to_hbm [thread:$0]  %s69_s23, 256, %s178_s3, [#allocation4], %s132_s15, %s132_s15, %s133_s16  }
  0x97   :  { %129 = dma.done.wait [#allocation4], 256  }
  0x98   :  { %130 = vsyncadd [#allocation4], 4294967040 }
  0x99   :  { %78 = vsyncpa [#allocation3], 1 }
  0x9a   :  { %79 = vsyncpa [#allocation4], 1 }

</bundles_post_ra>
